<compile_context>
chip_gen: v7x
topology: tpu7x:2x2x1
jax: 0.10.0
libtpu: 0.0.40
codegen_flags: <defaults>
</compile_context>

<pallas_src>
import jax
import jax.numpy as jnp
from jax.experimental import pallas as pl
from jax.experimental.pallas import tpu as pltpu


def _relu6_kernel(x_ref, o_ref):
    # ReLU6: clamp(x, 0, 6). Two VPU ops per vreg; trivially hidden under DMA.
    o_ref[...] = jnp.clip(x_ref[...], 0, 6)


def _round_up(a, b):
    return ((a + b - 1) // b) * b


def _chip_config():
    """Return (num_tensorcores, target_block_bytes) for the local TPU.

    v7x: 2 TCs, ~3.2 TB/s HBM -> 4 MiB blocks (16 MiB live with in+out double
         buffering; under the 32 MiB scoped default and 64 MiB physical VMEM).
    v6e: 1 TC, ~1.4 TB/s      -> 4 MiB blocks (16 MiB live < 32 MiB scoped).
    v5e / unknown: 1 TC        -> 2 MiB blocks (8 MiB live < 16 MiB scoped).
    """
    try:
        kind = jax.devices()[0].device_kind.lower()
    except Exception:
        kind = ""
    if "v7" in kind or "7x" in kind:
        return 2, 4 * 1024 * 1024
    if "v6" in kind:
        return 1, 4 * 1024 * 1024
    return 1, 2 * 1024 * 1024


def _choose_block_rows(rows, C, itemsize, sub, num_cores, target_block_bytes):
    """Pick a sublane-aligned block row count (or the full extent)."""
    br = max(sub, (target_block_bytes // (C * itemsize)) // sub * sub)
    if br >= rows:
        # Whole array fits in a single block.
        if num_cores > 1 and rows >= num_cores * sub:
            # v7x: split as evenly as sublane alignment allows so both TCs work.
            return _round_up(pl.cdiv(rows, num_cores), sub)
        # Single-TC chips (v5e/v6e): one full-extent block; a forced split is
        # pure per-step overhead on a sequential grid.
        return rows
    if num_cores > 1:
        steps = pl.cdiv(rows, br)
        if steps < 8 and steps % num_cores != 0:
            # A small odd step count leaves one TC with ~2x the work; even it.
            steps = _round_up(steps, num_cores)
            br = max(sub, _round_up(pl.cdiv(rows, steps), sub))
    return br


def relu6_pallas(x):
    """Elementwise ReLU6 via a tiled Pallas kernel. Works for any shape/dtype."""
    orig_shape = x.shape
    dtype = x.dtype
    n = x.size
    if n == 0:
        return x

    itemsize = jnp.dtype(dtype).itemsize
    # dtype-aware sublane granularity: f32 -> 8, bf16 -> 16, int8/fp8 -> 32.
    sub = max(8, 32 // itemsize)
    num_cores, target_block_bytes = _chip_config()

    flat = x.reshape(-1)

    # ---- lane-dense layout: widest C that divides n exactly (fast path) ----
    C = None
    for cand in (1024, 512, 256, 128):
        if n >= cand and n % cand == 0:
            C = cand
            break

    pad = 0
    if C is None:
        # Unaligned slow path: pad only up to a multiple of C (not sub*C); the
        # ragged last grid block copes with row counts not divisible by `sub`.
        # TODO(synk): for very large unaligned inputs, run the kernel on the
        # aligned prefix and patch the <C-element tail separately to avoid the
        # jnp.pad / trailing-slice extra HBM passes entirely.
        C = 512 if n >= 512 else 128
        pad = _round_up(n, C) - n
        flat = jnp.pad(flat, (0, pad))

    rows = (n + pad) // C
    x2d = flat.reshape(rows, C)

    block_rows = _choose_block_rows(rows, C, itemsize, sub, num_cores,
                                    target_block_bytes)
    grid = (pl.cdiv(rows, block_rows),)   # ragged last block OK (elementwise)

    # 2 buffers (double-buffer) x (in + out) per block live at once; leave a
    # block of headroom and stay well under physical VMEM on every generation.
    block_bytes = block_rows * C * itemsize
    vmem_limit = min(96 * 1024 * 1024, max(16 * 1024 * 1024, 5 * block_bytes))

    out2d = pl.pallas_call(
        _relu6_kernel,
        out_shape=jax.ShapeDtypeStruct((rows, C), dtype),
        grid_spec=pltpu.PrefetchScalarGridSpec(
            num_scalar_prefetch=0,
            grid=grid,
            in_specs=[pl.BlockSpec((block_rows, C), lambda i: (i, 0))],
            out_specs=pl.BlockSpec((block_rows, C), lambda i: (i, 0)),
        ),
        compiler_params=pltpu.CompilerParams(
            dimension_semantics=("parallel",),
            vmem_limit_bytes=vmem_limit),
    )(x2d)

    out_flat = out2d.reshape(-1)
    if pad:
        out_flat = out_flat[:n]
    return out_flat.reshape(orig_shape)


if __name__ == "__main__":
    key = jax.random.PRNGKey(0)
    relu6 = jax.jit(relu6_pallas)

    # NCHW input consistent with the layer test: batch=2, channels=4, 16x16.
    x = jax.random.normal(key, (2, 4, 16, 16), dtype=jnp.float32) * 5.0
    y = jax.block_until_ready(relu6(x))
    y_ref = jnp.clip(x, 0.0, 6.0)
    assert y.shape == x.shape and y.dtype == x.dtype
    assert jnp.allclose(y, y_ref), "f32 mismatch vs reference"

    # Awkward / non-aligned bf16 shape exercises the padded slow path.
    x2 = (jax.random.normal(jax.random.PRNGKey(1), (3, 5, 7)) * 5.0).astype(jnp.bfloat16)
    y2 = jax.block_until_ready(jax.jit(relu6_pallas)(x2))
    y2_ref = jnp.clip(x2, 0, 6)
    assert y2.shape == x2.shape and y2.dtype == x2.dtype
    assert jnp.allclose(y2.astype(jnp.float32), y2_ref.astype(jnp.float32)), \
        "bf16 mismatch vs reference"

    # Slightly larger unaligned f32 shape (pads to a multiple of C only).
    x3 = jax.random.normal(jax.random.PRNGKey(2), (3, 5, 37), dtype=jnp.float32) * 5.0
    y3 = jax.block_until_ready(jax.jit(relu6_pallas)(x3))
    assert jnp.allclose(y3, jnp.clip(x3, 0.0, 6.0)), "unaligned f32 mismatch"

    print("KERNEL_OK")
</pallas_src>

<mosaic_0001>
module attributes {stable_mosaic.version = 11 : i64} {
  func.func @_relu6_kernel(%arg0: i32, %arg1: memref<2x1024xf32, #tpu.memory_space<vmem>>, %arg2: memref<2x1024xf32, #tpu.memory_space<vmem>>) attributes {dimension_semantics = [#tpu.dimension_semantics<parallel>], iteration_bounds = array<i64: 1>, scalar_prefetch = 0 : i64, scratch_operands = 0 : i64, tpu.core_type = #tpu.core_type<tc>, window_params = [{transform_indices = @transform_0, window_bounds = array<i64: 2, 1024>}, {transform_indices = @transform_1, window_bounds = array<i64: 2, 1024>}]} {
    %c0 = arith.constant 0 : index
    %c0_0 = arith.constant 0 : index
    %0 = vector.load %arg1[%c0, %c0_0] : memref<2x1024xf32, #tpu.memory_space<vmem>>, vector<2x1024xf32>
    %c0_i32 = arith.constant 0 : i32
    %c6_i32 = arith.constant 6 : i32
    %1 = arith.sitofp %c0_i32 : i32 to f32
    %2 = vector.broadcast %1 : f32 to vector<2x1024xf32>
    %3 = arith.maximumf %2, %0 : vector<2x1024xf32>
    %4 = arith.sitofp %c6_i32 : i32 to f32
    %5 = vector.broadcast %4 : f32 to vector<2x1024xf32>
    %6 = arith.minimumf %5, %3 : vector<2x1024xf32>
    %c0_1 = arith.constant 0 : index
    %c0_2 = arith.constant 0 : index
    %7 = vector.load %arg2[%c0_1, %c0_2] : memref<2x1024xf32, #tpu.memory_space<vmem>>, vector<2x1024xf32>
    tpu.vector_store %arg2[%c0_1, %c0_2], %6 {strides = array<i32>} : memref<2x1024xf32, #tpu.memory_space<vmem>>, vector<2x1024xf32>,
    return
  }
  func.func @transform_0(%arg0: i32) -> (i32, i32) {
    %c0_i32 = arith.constant 0 : i32
    %c0_i32_0 = arith.constant 0 : i32
    return %arg0, %c0_i32 : i32, i32
  }
  func.func @transform_1(%arg0: i32) -> (i32, i32) {
    %c0_i32 = arith.constant 0 : i32
    %c0_i32_0 = arith.constant 0 : i32
    return %arg0, %c0_i32 : i32, i32
  }
}

</mosaic_0001>

<bundles_post_ra>
// kernel: relu6_pallas.1
= control target key start
LH: loop header
LB: loop body
LE: loop exit
PB: predicated region body
PF: predicated region fallthrough
CT: control target
= control target key end

     0   :  { %s42_s0 = inlined_call_operand.vmem [shape: f32[2,1024], index: 0, kind: input, shape index: {}]   ;;  %s43_s1 = inlined_call_operand.vmem [shape: f32[2,1024], index: 1, kind: output, shape index: {}]  }
   0x1   :  { %v8_v0 = vld [vmem:[%s42_s0] sm:$0xff]  ;;  %v9_v1 = vld [vmem:[%s42_s0 + $0x8] sm:$0xff] }
   0x2   :  { %v10_v2 = vmax.f32 %v8_v0, 0.0  ;;  %v11_v3 = vmax.f32 %v9_v1, 0.0 }
   0x4   :  { %v12_v4 = vmin.f32 %v10_v2, 6.0  ;;  %v13_v5 = vmin.f32 %v11_v3, 6.0 }
   0x6   :  { %14 = vst [vmem:[%s43_s1] sm:$0xff] %v12_v4  ;;  %15 = vst [vmem:[%s43_s1 + $0x8] sm:$0xff] %v13_v5 }

</bundles_post_ra>
